<compile_context>
chip_gen: v7x
topology: tpu7x:2x2x1
jax: 0.10.0
libtpu: 0.0.40
codegen_flags: <defaults>
</compile_context>

<pallas_src>
import jax
import jax.numpy as jnp
from jax.experimental import pallas as pl
from jax.experimental.pallas import tpu as pltpu


def _round_up(a, b):
    return ((a + b - 1) // b) * b


def _sublane(dtype):
    return {4: 8, 2: 16, 1: 32}.get(jnp.dtype(dtype).itemsize, 8)


def _chip_vmem_bytes():
    """Physical VMEM of the local chip; conservative fallback (v7x) on error."""
    try:
        return int(pltpu.get_tpu_info().vmem_capacity_bytes)
    except Exception:
        return 64 * 1024 * 1024


def _pick_th(H, th):
    """Largest TH <= th that divides H and is a multiple of 128 (or H itself).

    TH must divide H exactly: a ragged H tile would accumulate garbage from
    the padded weight columns into *valid* output rows.
    """
    th = min(th, H)
    if H % th == 0:
        return th
    cand = (th // 128) * 128
    while cand >= 128:
        if H % cand == 0:
            return cand
        cand -= 128
    return H


def prepare_residual_ffn_params(w1, b1, w2, b2):
    """One-time parameter prep (hoisted out of the per-call wrapper):
    bf16 weights for the MXU, f32 row-vector biases."""
    D, H = w1.shape
    return (w1.astype(jnp.bfloat16),
            b1.reshape(1, H).astype(jnp.float32),
            w2.astype(jnp.bfloat16),
            b2.reshape(1, D).astype(jnp.float32))


def residual_ffn_kernel(x_ref, w1_ref, b1_ref, w2_ref, b2_ref, o_ref, acc_ref):
    h_idx = pl.program_id(1)

    @pl.when(h_idx == 0)
    def _():
        acc_ref[...] = jnp.zeros_like(acc_ref)

    x = x_ref[...]                                      # (TM, D), resident across H steps

    # fn(x) chunk over H: Linear -> GELU(tanh) -> partial second Linear.
    h = jnp.dot(x.astype(jnp.bfloat16), w1_ref[...],    # (TM, TH) f32 accum
                preferred_element_type=jnp.float32) + b1_ref[...]
    h = jax.nn.gelu(h)                                  # EUP, hides under MXU
    acc_ref[...] += jnp.dot(h.astype(jnp.bfloat16), w2_ref[...],
                            preferred_element_type=jnp.float32)

    @pl.when(h_idx == pl.num_programs(1) - 1)
    def _():
        # Residual: fn(x) + x, in f32, then downcast once.
        o_ref[...] = (acc_ref[...] + b2_ref[...]
                      + x.astype(jnp.float32)).astype(o_ref.dtype)


def residual_ffn(x, params, *, tm=None, th=1024, out_dtype=None):
    """x: (B, S, D) -> (B, S, D); computes fn(x) + x with fn = 2-layer MLP."""
    w1_b, b1_2d, w2_b, b2_2d = params
    B, S, D = x.shape
    H = w1_b.shape[1]
    M = B * S
    out_dtype = x.dtype if out_dtype is None else out_dtype

    # Per-generation defaults: bigger tiles / higher VMEM limit on 128 MiB parts.
    vmem_cap = _chip_vmem_bytes()
    if vmem_cap >= 128 * 1024 * 1024:        # v5e / v6e
        default_tm = 512
        vmem_limit = 100 * 1024 * 1024
    else:                                    # v7x (64 MiB physical)
        default_tm = 256
        vmem_limit = 48 * 1024 * 1024
    tm = default_tm if tm is None else tm

    # Row tile: dtype-aware sublane rounding, and >= 2 grid steps when possible
    # (megacore sharding + pipelining); ragged last tile is allowed (masked
    # output stores, garbage rows never written back).
    sub = max(_sublane(x.dtype), _sublane(out_dtype))
    TM = min(tm, _round_up(M, sub))
    if -(-M // TM) < 2 and M > sub:
        TM = max(sub, _round_up(-(-M // 2), sub))
    grid_m = -(-M // TM)

    TH = _pick_th(H, th)
    grid_h = H // TH

    x2d = x.reshape(M, D)

    cost = pl.CostEstimate(
        flops=4 * M * D * H,                 # two matmuls
        transcendentals=M * H,               # tanh in GELU
        bytes_accessed=(M * D * x.dtype.itemsize
                        + M * D * jnp.dtype(out_dtype).itemsize
                        + 2 * D * H * 2      # w1 + w2 (bf16)
                        + 4 * (H + D)),      # biases
    )

    out2d = pl.pallas_call(
        residual_ffn_kernel,
        out_shape=jax.ShapeDtypeStruct((M, D), out_dtype),
        grid_spec=pltpu.PrefetchScalarGridSpec(
            num_scalar_prefetch=0,
            grid=(grid_m, grid_h),
            in_specs=[
                pl.BlockSpec((TM, D), lambda i, h: (i, 0)),   # x: tiled over M
                pl.BlockSpec((D, TH), lambda i, h: (0, h)),   # w1: tiled over H
                pl.BlockSpec((1, TH), lambda i, h: (0, h)),   # b1: tiled over H
                pl.BlockSpec((TH, D), lambda i, h: (h, 0)),   # w2: tiled over H
                pl.BlockSpec((1, D), lambda i, h: (0, 0)),    # b2: resident
            ],
            out_specs=pl.BlockSpec((TM, D), lambda i, h: (i, 0)),
            scratch_shapes=[pltpu.VMEM((TM, D), jnp.float32)],  # f32 accumulator
        ),
        compiler_params=pltpu.CompilerParams(
            dimension_semantics=("parallel", "arbitrary"),
            vmem_limit_bytes=vmem_limit,
        ),
        cost_estimate=cost,
    )(x2d, w1_b, b1_2d, w2_b, b2_2d)

    return out2d.reshape(B, S, D)


if __name__ == "__main__":
    # Small but MXU-friendly shapes: D and H multiples of 256 (full 256-wide
    # systolic passes on v6e/v7x; 128-multiples are already optimal on v5e).
    B, S, D, H = 2, 8, 256, 512

    key = jax.random.PRNGKey(0)
    kx, kw1, kb1, kw2, kb2 = jax.random.split(key, 5)

    x = jax.random.normal(kx, (B, S, D), dtype=jnp.float32)
    # Deterministic synthetic parameters (not a checkpoint load).
    w1 = jax.random.normal(kw1, (D, H), dtype=jnp.float32) * (1.0 / D) ** 0.5
    b1 = jax.random.normal(kb1, (H,), dtype=jnp.float32) * 0.01
    w2 = jax.random.normal(kw2, (H, D), dtype=jnp.float32) * (1.0 / H) ** 0.5
    b2 = jax.random.normal(kb2, (D,), dtype=jnp.float32) * 0.01

    # One-time param prep (casts hoisted out of the call path).
    params = prepare_residual_ffn_params(w1, b1, w2, b2)

    # th=256 so the demo exercises the H grid axis (grid_h=2) and the
    # accumulator init/finalize path; grid_m=2 exercises M pipelining/megacore.
    out = residual_ffn(x, params, tm=8, th=256)
    jax.block_until_ready(out)

    # Reference in plain f32 JAX (Residual semantics: fn(x) + x).
    # Tolerance loosened because the kernel feeds the MXU bf16 operands.
    ref = jax.nn.gelu(x @ w1 + b1) @ w2 + b2 + x
    assert out.shape == x.shape and out.dtype == x.dtype
    assert jnp.allclose(out, ref, atol=5e-2, rtol=5e-2), (
        float(jnp.max(jnp.abs(out - ref))))

    print("KERNEL_OK")
</pallas_src>

<mosaic_0001>
module attributes {stable_mosaic.version = 11 : i64} {
  func.func @residual_ffn_kernel(%arg0: i32, %arg1: i32, %arg2: memref<8x256xf32, #tpu.memory_space<vmem>>, %arg3: memref<256x256xbf16, #tpu.memory_space<vmem>>, %arg4: memref<1x256xf32, #tpu.memory_space<vmem>>, %arg5: memref<256x256xbf16, #tpu.memory_space<vmem>>, %arg6: memref<1x256xf32, #tpu.memory_space<vmem>>, %arg7: memref<8x256xf32, #tpu.memory_space<vmem>>, %arg8: memref<8x256xf32, #tpu.memory_space<vmem>>) attributes {dimension_semantics = [#tpu.dimension_semantics<parallel>, #tpu.dimension_semantics<arbitrary>], iteration_bounds = array<i64: 2, 2>, scalar_prefetch = 0 : i64, scratch_operands = 1 : i64, tpu.core_type = #tpu.core_type<tc>, window_params = [{transform_indices = @transform_0, window_bounds = array<i64: 8, 256>}, {transform_indices = @transform_1, window_bounds = array<i64: 256, 256>}, {transform_indices = @transform_2, window_bounds = array<i64: 1, 256>}, {transform_indices = @transform_3, window_bounds = array<i64: 256, 256>}, {pipeline_mode = #tpu.pipeline_mode<synchronous>, transform_indices = @transform_4, window_bounds = array<i64: 1, 256>}, {transform_indices = @transform_5, window_bounds = array<i64: 8, 256>}]} {
    %c0_i32 = arith.constant 0 : i32
    %0 = arith.cmpi eq, %arg1, %c0_i32 : i32
    %1 = arith.extui %0 : i1 to i32
    %c0_i32_0 = arith.constant 0 : i32
    %2 = arith.cmpi ne, %1, %c0_i32_0 : i32
    scf.if %2 {
      %cst_18 = arith.constant 0.000000e+00 : f32
      %32 = vector.broadcast %cst_18 : f32 to vector<8x256xf32>
      %c0_19 = arith.constant 0 : index
      %c0_20 = arith.constant 0 : index
      %33 = vector.load %arg8[%c0_19, %c0_20] : memref<8x256xf32, #tpu.memory_space<vmem>>, vector<8x256xf32>
      tpu.vector_store %arg8[%c0_19, %c0_20], %32 {strides = array<i32>} : memref<8x256xf32, #tpu.memory_space<vmem>>, vector<8x256xf32>,
    } else {
    }
    %c0 = arith.constant 0 : index
    %c0_1 = arith.constant 0 : index
    %3 = vector.load %arg2[%c0, %c0_1] : memref<8x256xf32, #tpu.memory_space<vmem>>, vector<8x256xf32>
    %4 = arith.truncf %3 : vector<8x256xf32> to vector<8x256xbf16>
    %c0_2 = arith.constant 0 : index
    %c0_3 = arith.constant 0 : index
    %5 = vector.load %arg3[%c0_2, %c0_3] : memref<256x256xbf16, #tpu.memory_space<vmem>>, vector<256x256xbf16>
    %cst = arith.constant dense<0.000000e+00> : vector<8x256xf32>
    %6 = tpu.matmul %4, %5, %cst {dimension_numbers = #tpu.dot_dimension_numbers<[1], [0], [0], [1], [0, 0, 1, 1], [], []>} : vector<8x256xbf16>, vector<256x256xbf16>, vector<8x256xf32> -> vector<8x256xf32>
    %c0_4 = arith.constant 0 : index
    %c0_5 = arith.constant 0 : index
    %7 = vector.load %arg4[%c0_4, %c0_5] : memref<1x256xf32, #tpu.memory_space<vmem>>, vector<1x256xf32>
    %8 = vector.broadcast %7 : vector<1x256xf32> to vector<8x256xf32>
    %9 = arith.addf %6, %8 : vector<8x256xf32>
    %10 = arith.mulf %9, %9 : vector<8x256xf32>
    %11 = arith.mulf %9, %10 : vector<8x256xf32>
    %cst_6 = arith.constant 4.471500e-02 : f32
    %12 = vector.broadcast %cst_6 : f32 to vector<8x256xf32>
    %13 = arith.mulf %12, %11 : vector<8x256xf32>
    %14 = arith.addf %9, %13 : vector<8x256xf32>
    %cst_7 = arith.constant 0.797884583 : f32
    %15 = vector.broadcast %cst_7 : f32 to vector<8x256xf32>
    %16 = arith.mulf %15, %14 : vector<8x256xf32>
    %17 = math.tanh %16 : vector<8x256xf32>
    %cst_8 = arith.constant 1.000000e+00 : f32
    %18 = vector.broadcast %cst_8 : f32 to vector<8x256xf32>
    %19 = arith.addf %18, %17 : vector<8x256xf32>
    %cst_9 = arith.constant 5.000000e-01 : f32
    %20 = vector.broadcast %cst_9 : f32 to vector<8x256xf32>
    %21 = arith.mulf %20, %19 : vector<8x256xf32>
    %22 = arith.mulf %9, %21 : vector<8x256xf32>
    %c0_10 = arith.constant 0 : index
    %c0_11 = arith.constant 0 : index
    %23 = vector.load %arg8[%c0_10, %c0_11] : memref<8x256xf32, #tpu.memory_space<vmem>>, vector<8x256xf32>
    %24 = arith.truncf %22 : vector<8x256xf32> to vector<8x256xbf16>
    %c0_12 = arith.constant 0 : index
    %c0_13 = arith.constant 0 : index
    %25 = vector.load %arg5[%c0_12, %c0_13] : memref<256x256xbf16, #tpu.memory_space<vmem>>, vector<256x256xbf16>
    %cst_14 = arith.constant dense<0.000000e+00> : vector<8x256xf32>
    %26 = tpu.matmul %24, %25, %cst_14 {dimension_numbers = #tpu.dot_dimension_numbers<[1], [0], [0], [1], [0, 0, 1, 1], [], []>} : vector<8x256xbf16>, vector<256x256xbf16>, vector<8x256xf32> -> vector<8x256xf32>
    %27 = arith.addf %23, %26 : vector<8x256xf32>
    %c0_15 = arith.constant 0 : index
    %c0_16 = arith.constant 0 : index
    %28 = vector.load %arg8[%c0_15, %c0_16] : memref<8x256xf32, #tpu.memory_space<vmem>>, vector<8x256xf32>
    tpu.vector_store %arg8[%c0_15, %c0_16], %27 {strides = array<i32>} : memref<8x256xf32, #tpu.memory_space<vmem>>, vector<8x256xf32>,
    %c1_i32 = arith.constant 1 : i32
    %29 = arith.cmpi eq, %arg1, %c1_i32 : i32
    %30 = arith.extui %29 : i1 to i32
    %c0_i32_17 = arith.constant 0 : i32
    %31 = arith.cmpi ne, %30, %c0_i32_17 : i32
    scf.if %31 {
      %c0_18 = arith.constant 0 : index
      %c0_19 = arith.constant 0 : index
      %32 = vector.load %arg8[%c0_18, %c0_19] : memref<8x256xf32, #tpu.memory_space<vmem>>, vector<8x256xf32>
      %c0_20 = arith.constant 0 : index
      %c0_21 = arith.constant 0 : index
      %33 = vector.load %arg6[%c0_20, %c0_21] : memref<1x256xf32, #tpu.memory_space<vmem>>, vector<1x256xf32>
      %34 = vector.broadcast %33 : vector<1x256xf32> to vector<8x256xf32>
      %35 = arith.addf %32, %34 : vector<8x256xf32>
      %36 = arith.addf %35, %3 : vector<8x256xf32>
      %c0_22 = arith.constant 0 : index
      %c0_23 = arith.constant 0 : index
      %37 = vector.load %arg7[%c0_22, %c0_23] : memref<8x256xf32, #tpu.memory_space<vmem>>, vector<8x256xf32>
      tpu.vector_store %arg7[%c0_22, %c0_23], %36 {strides = array<i32>} : memref<8x256xf32, #tpu.memory_space<vmem>>, vector<8x256xf32>,
    } else {
    }
    return
  }
  func.func @transform_0(%arg0: i32, %arg1: i32) -> (i32, i32) {
    %c0_i32 = arith.constant 0 : i32
    %c0_i32_0 = arith.constant 0 : i32
    return %arg0, %c0_i32 : i32, i32
  }
  func.func @transform_1(%arg0: i32, %arg1: i32) -> (i32, i32) {
    %c0_i32 = arith.constant 0 : i32
    %c0_i32_0 = arith.constant 0 : i32
    return %c0_i32, %arg1 : i32, i32
  }
  func.func @transform_2(%arg0: i32, %arg1: i32) -> (i32, i32) {
    %c0_i32 = arith.constant 0 : i32
    %c0_i32_0 = arith.constant 0 : i32
    return %c0_i32, %arg1 : i32, i32
  }
  func.func @transform_3(%arg0: i32, %arg1: i32) -> (i32, i32) {
    %c0_i32 = arith.constant 0 : i32
    %c0_i32_0 = arith.constant 0 : i32
    return %arg1, %c0_i32 : i32, i32
  }
  func.func @transform_4(%arg0: i32, %arg1: i32) -> (i32, i32) {
    %c0_i32 = arith.constant 0 : i32
    %c0_i32_0 = arith.constant 0 : i32
    %c0_i32_1 = arith.constant 0 : i32
    return %c0_i32, %c0_i32_0 : i32, i32
  }
  func.func @transform_5(%arg0: i32, %arg1: i32) -> (i32, i32) {
    %c0_i32 = arith.constant 0 : i32
    %c0_i32_0 = arith.constant 0 : i32
    return %arg0, %c0_i32 : i32, i32
  }
}

</mosaic_0001>

<bundles_post_ra>
// kernel: tpu_custom_call.1
= control target key start
LH: loop header
LB: loop body
LE: loop exit
PB: predicated region body
PF: predicated region fallthrough
CT: control target
= control target key end

     0   :  { %s2049_s0 = inlined_call_operand.hbm [shape: f32[16,256], index: 0, kind: input, shape index: {}]   ;;  %s2050_s1 = inlined_call_operand.hbm [shape: bf16[256,512], index: 1, kind: input, shape index: {}]   ;;  %s2051_s2 = inlined_call_operand.vmem [shape: f32[1,512], index: 2, kind: input, shape index: {}]   ;;  %s2052_s3 = inlined_call_operand.hbm [shape: bf16[512,256], index: 3, kind: input, shape index: {}]   ;;  %s2053_s4 = inlined_call_operand.vmem [shape: f32[1,256], index: 4, kind: input, shape index: {}]   ;;  %s2054_s5 = inlined_call_operand.hbm [shape: f32[16,256], index: 5, kind: output, shape index: {}]  }
   0x1   :  { %2067 = sst [smem:[#allocation20_spill]] %s2050_s1 }
   0x2   :  { %2068 = sst [smem:[#allocation21_spill]] %s2051_s2 }
   0x3   :  { %2069 = sst [smem:[#allocation22_spill]] %s2053_s4 }
   0x4   :  { %2070 = sst [smem:[#allocation23_spill]] %s2054_s5 }
   0x5   :  { %10 = vsyncpa [#allocation4], 0 }
   0x6   :  { %12 = vsyncpa [#allocation4 + $0x1], 0 }
   0x7   :  { %13 = vsyncpa [#allocation7], 0 }
   0x8   :  { %15 = vsyncpa [#allocation7 + $0x1], 0 }
   0x9   :  { %16 = vsyncpa [#allocation5], 0 }
   0xa   :  { %18 = vsyncpa [#allocation5 + $0x1], 0  ;;  %s1606_s18 = smov 0   ;;  %s1608_s19 = smov 0  }
   0xb   :  { %s1610_s20 = smov 0   ;;  %s1612_s21 = smov 0  }
   0xc   :  { %s1614_s22 = smov 0   ;;  %s1616_s23 = smov 0  }
   0xd   :  { %s1618_s24 = smov 0   ;;  %s1620_s25 = smov 0  }
   0xe   :  { %s1622_s26 = smov 0   ;;  %s1624_s27 = smov 0  }
   0xf   :  { %s1626_s28 = smov 0  }
  0x10 LB: > { %2071 = sst [smem:[#allocation13_spill]] %s1546_s23  ;;  %p51_p0 = scmp.eq.s32.totalorder %s1566_s28, 0  ;;  %s1566_s28 = sphi %s1626_s28, %s24_s28   ;;  %s1562_s27 = sphi %s1624_s27, %s2108_s27   ;;  %s1558_s26 = sphi %s1622_s26, %s2115_s26   ;;  %s1554_s25 = sphi %s1620_s25, %s2106_s25   ;;  %s1550_s24 = sphi %s1618_s24, %s2114_s24   ;;  %s1546_s23 = sphi %s1616_s23, %s2105_s23   ;;  %s1542_s22 = sphi %s1614_s22, %s2113_s22   ;;  %s1538_s21 = sphi %s1612_s21, %s2112_s21   ;;  %s1534_s20 = sphi %s1610_s20, %s2111_s20   ;;  %s1530_s19 = sphi %s1608_s19, %s2110_s19   ;;  %s1526_s18 = sphi %s1606_s18, %s2109_s18  }
  0x11   : > { %2072 = sst [smem:[#allocation14_spill]] %s1554_s25  ;;  %p76_p1 = scmp.ne.s32.totalorder %s1534_s20, %s1530_s19 }
  0x12   : > { %2073 = sst [smem:[#allocation15_spill]] %s1562_s27  ;;  %p2055_p2 = scmp.lt.s32.totalorder %s1566_s28, 4 }
  0x13   : > { %s227_s30 = sand.u32 1, %s1566_s28   ;;  %p78_p3 = por %p76_p1, %p51_p0 }
  0x14   : > { %s229_s6 = sand.u32 1, %s1534_s20   ;;  %s1130_s7 = sshll.u32 %s1558_s26, 7 }
  0x15   : > { %s1671_s8 = sshll.u32 %s229_s6, 8  ;;  %s2074_s1 = sld [smem:[#allocation20_spill]] }
  0x16   : > { %p1680_p4 = pnand %p2055_p2, %p78_p3  ;;  %s231_s13 = scalar_lea.vmem [#allocation6], %s1671_s8 }
  0x17   : > { %s238_s14 = sshll.u32 %s231_s13, 4  ;;  %s1687_s15 = scalar_lea.sflag [#allocation7], %s227_s30  ;;  %s1685_s14 = int_to_ptr.vmem [resolvable:$true] %s238_s14 }
  0x18   : > { %p2060_p6 = pneg %p1680_p4 }
  0x1b   : > { %s1676_s11 = scalar_lea.hbm %s2074_s1, %s1130_s7  ;;  %s1355_s7 = scalar_lea.hbm %s2074_s1, 8192 }
  0x1c   : > { %s1350_s16 = scalar_lea.hbm %s1676_s11, 4096  ;;  %p1356_p9 = scmp.lt.u32.totalorder %s1676_s11, %s2074_s1 }
  0x1d   : > { %p1351_p5 = scmp.ne.s32.totalorder %s1676_s11, %s1350_s16  ;;  %p1357_p10 = scmp.lt.u32.totalorder %s1355_s7, %s1350_s16 }
  0x1e   : > { %p1359_p12 = scmp.lt.u32.totalorder %s1350_s16, %s1676_s11 }
  0x1f   : > { %p1353_p7 = pnand %p2060_p6, %p1351_p5  ;;  %p1358_p11 = por %p1357_p10, %p1356_p9 }
  0x21   : > { %p1354_p8 = pneg %p1353_p7  ;;  %p1360_p13 = por %p1359_p12, %p1358_p11 }
  0x23   : > { %p1361_p1 = pnand %p1360_p13, %p1354_p8 }
  0x25   : > { %1364 = shalt.err (!%p1361_p1)
}
  0x26   : > { %s1365_s30 = scalar_lea.vmem %s1685_s14, 4096  ;;  %s1568_s13 = smov [#allocation6]  }
  0x27   : > { %p1366_p3 = scmp.ne.s32.totalorder %s1685_s14, %s1365_s30  ;;  %s1370_s17 = sshll.u32 %s1568_s13, 4  ;;  %s1371_s17 = int_to_ptr.vmem [resolvable:$false] %s1370_s17 }
  0x28   : > { %s1372_s6 = scalar_lea.vmem %s1371_s17, 8192  ;;  %p1373_p2 = scmp.lt.s32.totalorder %s1685_s14, %s1371_s17 }
  0x29   : > { %p1368_p5 = pnand %p1366_p3, %p2060_p6  ;;  %p1374_p9 = scmp.lt.s32.totalorder %s1372_s6, %s1365_s30 }
  0x2b   : > { %p1369_p7 = pneg %p1368_p5  ;;  %p1375_p10 = por %p1374_p9, %p1373_p2 }
  0x2d   : > { %p1376_p11 = pnand %p1375_p10, %p1369_p7 }
  0x2f   : > { %1379 = shalt.err (!%p1376_p11)
}
  0x30   : > { %s1569_s16 = smov 256   ;;  %s2056_s7 = smov 128  }
  0x31   : > { %s2057_s9 = smov 8   ;;  %p1052_p2 = scmp.ge.s32.totalorder %s1566_s28, 1 }
  0x32   : > { %1148 = dma.hbm_to_vmem [thread:$0]  (!%p1680_p4), %s1676_s11, 4096, %s1685_s14, %s1687_s15, %s1569_s16, %s2056_s7, %s2057_s9  }
  0x33   : > { %p276_p8 = scmp.lt.s32.totalorder %s1566_s28, 5  ;;  %s1724_s30 = sadd.s32 4294967295, %s1566_s28  }
  0x34   : > { %s1039_s13 = sadd.s32 4294967294, %s1566_s28   ;;  %s33_s17 = sadd.s32 1, %s1558_s26 }
  0x35   : > { %p1719_p12 = pnand %p1052_p2, %p276_p8  ;;  %p34_p13 = scmp.ge.s32.totalorder %s33_s17, 2 }
  0x36   : > { %s36_s6 = sadd.s32 1, %s1562_s27  ;;  %s43_s11 = sadd.s32 1, %s1546_s23 }
  0x37   : > { %s2076_s10 = scalar_select %p1719_p12, 1, 0 }
  0x38   : > { %p50_p1 = scmp.ne.s32.totalorder %s1546_s23, %s1542_s22  ;;  %s2117_s17 = smov (%p34_p13, %s33_s17), 0 }
  0x39   : > { %2077 = sst [smem:[#allocation16_spill]] %s2117_s17  ;;  %s2119_s6 = smov (!%p34_p13, %s36_s6), %s1562_s27 }
  0x3a   : > { %p1740_p3 = por %p51_p0, %p50_p1  ;;  %p56_p5 = scmp.ne.s32.totalorder %s1542_s22, %s1538_s21 }
  0x3b   : > { %p38_p7 = scmp.ge.s32.totalorder %s2119_s6, 2  ;;  %p57_p9 = scmp.eq.s32.totalorder %s1724_s30, 0 }
  0x3c   : > { %s66_s16 = ssub.s32 %s1558_s26, %s2117_s17  ;;  %p82_p10 = scmp.ne.s32.totalorder %s1530_s19, %s1526_s18 }
  0x3d   : > { %s2121_s6 = smov (%p38_p7, %s2119_s6), 0  ;;  %p1756_p11 = por %p57_p9, %p56_p5 }
  0x3e   : > { %2079 = sst [smem:[#allocation17_spill]] %s2121_s6  ;;  %p67_p0 = scmp.eq.s32.totalorder %s66_s16, 0 }
  0x3f   : > { %s2080_s7 = scalar_select %p1756_p11, 1, 0 }
  0x40   : > { %s40_s9 = ssub.s32 %s1562_s27, %s2121_s6  ;;  %p1762_p2 = por %p82_p10, %p57_p9 }
  0x41   : > { %p41_p8 = scmp.eq.s32.totalorder %s40_s9, 0  ;;  %p179_p13 = scmp.eq.s32.totalorder %s1724_s30, 3 }
  0x42   : > { %s2081_s29 = scalar_select %p1762_p2, 1, 0 }
  0x43   : > { %s2082_s1 = sadd.s32 1, %s1534_s20  ;;  %p1778_p7 = por %p179_p13, %p50_p1 }
  0x44   : > { %s1770_s18 = scalar_select %p67_p0, %s1534_s20, %s2082_s1  }
  0x45   : > { %s1773_s17 = scalar_select %p41_p8, %s1546_s23, %s43_s11  }
  0x46   : > { %2083 = sst [smem:[#allocation18_spill]] %s1770_s18  ;;  %p185_p6 = scmp.eq.s32.totalorder %s1039_s13, 3 }
  0x47   : > { %2084 = sst [smem:[#allocation19_spill]] %s1773_s17  ;;  %s208_s25 = sand.u32 1, %s1546_s23  }
  0x48   : > { %s2085_s5 = scalar_select %p1778_p7, 1, 0 }
  0x49   : > { %s1129_s16 = sshll.u32 %s1562_s27, 8  ;;  %p1787_p9 = por %p185_p6, %p56_p5 }
  0x4a   : > { %s1042_s9 = sshll.u32 %s208_s25, 4  ;;  %s1794_s1 = scalar_lea.hbm %s2049_s0, %s1129_s16 }
  0x4b   : > { %s2086_s6 = scalar_select %p1787_p9, 1, 0 }
  0x4c   : > { %p2087_p10 = scmp.lt.s32.totalorder %s1566_s28, 4  ;;  %s212_s11 = scalar_lea.vmem [#allocation3], %s1042_s9 }
  0x4d   : > { %s220_s27 = sshll.u32 %s212_s11, 4  ;;  %s209_s17 = scalar_lea.sflag [#allocation4], %s208_s25  ;;  %s1804_s27 = int_to_ptr.vmem [resolvable:$true] %s220_s27 }
  0x4e   : > { %p1800_p1 = pnand %p2087_p10, %p1740_p3  ;;  %s1380_s2 = scalar_lea.hbm %s1794_s1, 256 }
  0x4f   : > { %p1381_p6 = scmp.ne.s32.totalorder %s1794_s1, %s1380_s2  ;;  %s1385_s16 = scalar_lea.hbm %s2049_s0, 512 }
  0x50   : > { %p1382_p5 = pneg %p1800_p1  ;;  %p1386_p3 = scmp.lt.u32.totalorder %s1794_s1, %s2049_s0 }
  0x51   : > { %p1387_p13 = scmp.lt.u32.totalorder %s1385_s16, %s1380_s2  ;;  %p1389_p9 = scmp.lt.u32.totalorder %s1380_s2, %s1794_s1 }
  0x52   : > { %p1383_p0 = pnand %p1382_p5, %p1381_p6 }
  0x53   : > { %p1388_p10 = por %p1387_p13, %p1386_p3 }
  0x54   : > { %p1384_p8 = pneg %p1383_p0 }
  0x55   : > { %p1390_p7 = por %p1389_p9, %p1388_p10 }
  0x57   : > { %p1391_p2 = pnand %p1390_p7, %p1384_p8 }
  0x59   : > { %1394 = shalt.err (!%p1391_p2)
}
  0x5a   : > { %s1395_s25 = scalar_lea.vmem %s1804_s27, 256  ;;  %s1572_s9 = smov [#allocation3]  }
  0x5b   : > { %p1396_p6 = scmp.ne.s32.totalorder %s1804_s27, %s1395_s25  ;;  %s1400_s11 = sshll.u32 %s1572_s9, 4  ;;  %s1401_s11 = int_to_ptr.vmem [resolvable:$false] %s1400_s11 }
  0x5c   : > { %s1402_s23 = scalar_lea.vmem %s1401_s11, 512  ;;  %p1403_p12 = scmp.lt.s32.totalorder %s1804_s27, %s1401_s11 }
  0x5d   : > { %p1398_p0 = pnand %p1396_p6, %p1382_p5  ;;  %p1404_p3 = scmp.lt.s32.totalorder %s1402_s23, %s1395_s25 }
  0x5f   : > { %p1399_p11 = pneg %p1398_p0  ;;  %p1405_p13 = por %p1404_p3, %p1403_p12 }
  0x61   : > { %p1406_p9 = pnand %p1405_p13, %p1399_p11 }
  0x63   : > { %1409 = shalt.err (!%p1406_p9)
}
  0x64   : > { %1145 = dma.hbm_to_vmem [thread:$0]  (!%p1800_p1), %s1794_s1, 256, %s1804_s27, %s209_s17  }
  0x65   : > { %s1132_s18 = sshll.u32 %s1558_s26, 12  ;;  %s260_s2 = scalar_lea.vmem [#allocation8], %s1671_s8 }
  0x66   : > { %s268_s4 = sshll.u32 %s260_s2, 4  ;;  %s1836_s9 = scalar_lea.hbm %s2052_s3, %s1132_s18  ;;  %s1838_s4 = int_to_ptr.vmem [resolvable:$true] %s268_s4 }
  0x67   : > { %s1410_s13 = scalar_lea.hbm %s1836_s9, 4096  ;;  %p2089_p11 = pneg %p1680_p4 }
  0x68   : > { %p1411_p12 = scmp.ne.s32.totalorder %s1836_s9, %s1410_s13  ;;  %s1415_s17 = scalar_lea.hbm %s2052_s3, 8192 }
  0x69   : > { %p1416_p1 = scmp.lt.u32.totalorder %s1836_s9, %s2052_s3  ;;  %p1417_p5 = scmp.lt.u32.totalorder %s1415_s17, %s1410_s13 }
  0x6a   : > { %p1413_p2 = pnand %p1411_p12, %p2089_p11  ;;  %p1419_p10 = scmp.lt.u32.totalorder %s1410_s13, %s1836_s9 }
  0x6b   : > { %p1418_p8 = por %p1417_p5, %p1416_p1 }
  0x6c   : > { %p1414_p7 = pneg %p1413_p2 }
  0x6d   : > { %p1420_p6 = por %p1419_p10, %p1418_p8 }
  0x6f   : > { %p1421_p0 = pnand %p1420_p6, %p1414_p7 }
  0x71   : > { %1424 = shalt.err (!%p1421_p0)
}
  0x72   : > { %s1425_s11 = scalar_lea.vmem %s1838_s4, 4096  ;;  %p2090_p13 = pmov %p2089_p11 }
  0x73   : > { %p1426_p3 = scmp.ne.s32.totalorder %s1838_s4, %s1425_s11  ;;  %s1573_s23 = smov [#allocation8]  }
  0x74   : > { %s1430_s18 = sshll.u32 %s1573_s23, 4  ;;  %s1431_s18 = int_to_ptr.vmem [resolvable:$false] %s1430_s18 }
  0x75   : > { %p1428_p9 = pnand %p1426_p3, %p2090_p13  ;;  %s1432_s2 = scalar_lea.vmem %s1431_s18, 8192 }
  0x76   : > { %p1433_p11 = scmp.lt.s32.totalorder %s1838_s4, %s1431_s18  ;;  %p1434_p2 = scmp.lt.s32.totalorder %s1432_s2, %s1425_s11 }
  0x77   : > { %p1429_p12 = pneg %p1428_p9 }
  0x78   : > { %p1435_p1 = por %p1434_p2, %p1433_p11 }
  0x7a   : > { %p1436_p5 = pnand %p1435_p1, %p1429_p12 }
  0x7c   : > { %1439 = shalt.err (!%p1436_p5)
}
  0x7d   : > { %s2091_s14 = smov 8   ;;  %s2092_s16 = smov 128  }
  0x7e   : > { %1151 = dma.hbm_to_vmem [thread:$0]  (!%p1680_p4), %s1836_s9, 4096, %s1838_s4, %s1687_s15, %s2092_s16, %s2092_s16, %s2091_s14  }
  0x7f   : > { %p2093_p7 = scmp.ne.s32.totalorder %s2076_s10, 0 }
  0x80   : > { %s1870_s13 = sand.u32 (!%p2093_p7), 1, %s1542_s22   ;;  %p2094_p8 = scmp.ne.s32.totalorder (!%p2093_p7), %s2080_s7, 0 }
  0x81   : > { %280 = sbr.rel (%p2093_p7) target bundleno = 718 (0x2ce), region = 40  ;;  %s1053_s27 = sshll.u32 (!%p2093_p7), %s1870_s13, 4 }
  0x82   : > { %s283_s8 = scalar_lea.sflag (!%p2093_p7), [#allocation4], %s1870_s13  ;;  %s1874_s17 = scalar_lea.vmem (!%p2093_p7), [#allocation3], %s1053_s27 }
  0x88   : > { %1513 = dma.done.wait (%p2094_p8), %s283_s8, 256  }
  0x89   : > { %1515 = vsyncadd (%p2094_p8), %s283_s8, 4294967040  ;;  %s291_s12 = sand.u32 1, %s1724_s30   ;;  %s293_s15 = sand.u32 1, %s1530_s19  }
  0x8a   : > { %s1054_s10 = sshll.u32 %s293_s15, 8  ;;  %s292_s4 = scalar_lea.sflag [#allocation7], %s291_s12 }
  0x8b   : > { %s1882_s9 = scalar_lea.vmem [#allocation6], %s1054_s10  ;;  %p2095_p4 = scmp.ne.s32.totalorder %s2081_s29, 0 }
  0x8d   : > { %1517 = dma.done.wait (%p2095_p4), %s292_s4, 8192  }
  0x8e   : > { %1519 = vsyncadd (%p2095_p4), %s292_s4, 4294959104  ;;  %s1057_s1 = sshll.u32 %s1550_s24, 1  ;;  %s2096_s11 = sld [smem:[#allocation21_spill]] }
  0x8f   : > { %p347_p10 = scmp.lt.s32.totalorder %s1057_s1, 3  ;;  %s1895_s23 = scalar_lea.vmem [#allocation8], %s1054_s10 }
  0x90   : > { %s1897_s18 = scalar_lea.vmem [#allocation9], %s1053_s27  ;;  %p1058_p6 = scmp.ne.s32.totalorder %s1550_s24, 0 }
  0x91   : > { %s2123_s1 = smov (!%p347_p10, %s1057_s1), 3  ;;  %v1574_v0 = vmov (!%p1058_p6), 0.0  }
  0x92   : > { %355 = sbr.rel (%p1058_p6) target bundleno = 153 (0x99), region = 56  ;;  %356 = vst [vmem:[#allocation2] sm:$0xff] (!%p1058_p6), %v1574_v0  ;;  %357 = vst [vmem:[#allocation2 + $0x8] sm:$0xff] (!%p1058_p6), %v1574_v0 }
  0x94   : > { %s349_s30 = scalar_lea.vmem %s2096_s11, %s2123_s1 }
  0x99 PF: > { %v1250_v1 = vld [vmem:[%s1882_s9 + $0x4] ss:$8 sps:$4 sm:$0xff]   ;;  %v1252_v2 = vld [vmem:[%s1882_s9] ss:$8 sps:$4 sm:$0xff]   ;;  %v1253_v3 = vld [vmem:[%s1882_s9 + $0x14] ss:$8 sps:$4 sm:$0xff]  }
  0x9a   : > { %566 = vmatprep.subr.bf16.mxu0 %v1250_v1  ;;  %v1255_v4 = vld [vmem:[%s1882_s9 + $0x10] ss:$8 sps:$4 sm:$0xff]   ;;  %v1256_v5 = vld [vmem:[%s1882_s9 + $0x24] ss:$8 sps:$4 sm:$0xff]   ;;  %v1258_v6 = vld [vmem:[%s1882_s9 + $0x20] ss:$8 sps:$4 sm:$0xff]  }
  0x9b   : > { %567 = vmatpush1.bf16.msra.mxu0 %v1252_v2  ;;  %v1259_v7 = vld [vmem:[%s1882_s9 + $0x34] ss:$8 sps:$4 sm:$0xff]   ;;  %v1261_v8 = vld [vmem:[%s1882_s9 + $0x30] ss:$8 sps:$4 sm:$0xff]   ;;  %v1262_v9 = vld [vmem:[%s1882_s9 + $0x44] ss:$8 sps:$4 sm:$0xff]  }
  0x9c   : > { %568 = vmatprep.subr.bf16.mxu0 %v1253_v3  ;;  %v1264_v10 = vld [vmem:[%s1882_s9 + $0x40] ss:$8 sps:$4 sm:$0xff]   ;;  %v1265_v11 = vld [vmem:[%s1882_s9 + $0x54] ss:$8 sps:$4 sm:$0xff]   ;;  %v1267_v12 = vld [vmem:[%s1882_s9 + $0x50] ss:$8 sps:$4 sm:$0xff]  }
  0x9d   : > { %v1268_v13 = vld [vmem:[%s1882_s9 + $0x64] ss:$8 sps:$4 sm:$0xff]   ;;  %v1270_v14 = vld [vmem:[%s1882_s9 + $0x60] ss:$8 sps:$4 sm:$0xff]   ;;  %v1271_v19 = vld [vmem:[%s1882_s9 + $0x74] ss:$8 sps:$4 sm:$0xff]  }
  0x9e   : > { %v1915_v15 = vld [vmem:[%s1874_s17 + $0x8] sm:$0xff]  ;;  %v1954_v51 = vld [vmem:[%s1874_s17] sm:$0xff]  ;;  %p1123_p0 = scmp.ne.s32.totalorder %s1550_s24, 1 }
  0x9f   : > { %569 = vmatpush1.bf16.msra.mxu0 %v1255_v4  ;;  %v361_v16 = vpack.c.bf16 %v1915_v15, %v1915_v15  ;;  %v1298_v17 = vld [vmem:[%s1895_s23 + $0x4] ss:$8 sps:$4 sm:$0xff]   ;;  %v1300_v18 = vld [vmem:[%s1895_s23] ss:$8 sps:$4 sm:$0xff]   ;;  %v1301_v20 = vld [vmem:[%s1895_s23 + $0x14] ss:$8 sps:$4 sm:$0xff]   ;;  %v360_v52 = vpack.c.bf16 %v1954_v51, %v1954_v51 }
  0xa0   : > { %570 = vmatprep.subr.bf16.mxu0 %v1256_v5  ;;  %v1273_v21 = vld [vmem:[%s1882_s9 + $0x70] ss:$8 sps:$4 sm:$0xff]   ;;  %821 = vmatprep.subr.bf16.mxu1 %v1298_v17  ;;  %v1304_v23 = vld [vmem:[%s1895_s23 + $0x24] ss:$8 sps:$4 sm:$0xff]   ;;  %v1276_v25 = vld [vmem:[%s1882_s9 + $0x80] ss:$8 sps:$4 sm:$0xff]   ;;  %v396_v5 = vlaneseq }
  0xa1   : > { %598 = vmatprep.mubr.bf16.mxu0 %v361_v16  ;;  %822 = vmatpush1.bf16.msra.mxu1 %v1300_v18  ;;  %v1303_v22 = vld [vmem:[%s1895_s23 + $0x10] ss:$8 sps:$4 sm:$0xff]   ;;  %v1274_v24 = vld [vmem:[%s1882_s9 + $0x84] ss:$8 sps:$4 sm:$0xff]   ;;  %v1306_v26 = vld [vmem:[%s1895_s23 + $0x20] ss:$8 sps:$4 sm:$0xff]  }
  0xa2   : > { %823 = vmatprep.subr.bf16.mxu1 %v1301_v20  ;;  %v1307_v27 = vld [vmem:[%s1895_s23 + $0x34] ss:$8 sps:$4 sm:$0xff]   ;;  %v1309_v29 = vld [vmem:[%s1895_s23 + $0x30] ss:$8 sps:$4 sm:$0xff]   ;;  %v1310_v31 = vld [vmem:[%s1895_s23 + $0x44] ss:$8 sps:$4 sm:$0xff]  }
  0xa3   : > { %571 = vmatpush1.bf16.msra.mxu0 %v1258_v6  ;;  %v1277_v28 = vld [vmem:[%s1882_s9 + $0x94] ss:$8 sps:$4 sm:$0xff]   ;;  %v1279_v30 = vld [vmem:[%s1882_s9 + $0x90] ss:$8 sps:$4 sm:$0xff]   ;;  %v1280_v32 = vld [vmem:[%s1882_s9 + $0xa4] ss:$8 sps:$4 sm:$0xff]  }
  0xa4   : > { %572 = vmatprep.subr.bf16.mxu0 %v1259_v7  ;;  %v1312_v33 = vld [vmem:[%s1895_s23 + $0x40] ss:$8 sps:$4 sm:$0xff]   ;;  %v1313_v35 = vld [vmem:[%s1895_s23 + $0x54] ss:$8 sps:$4 sm:$0xff]   ;;  %v1315_v37 = vld [vmem:[%s1895_s23 + $0x50] ss:$8 sps:$4 sm:$0xff]  }
  0xa5   : > { %824 = vmatpush1.bf16.msra.mxu1 %v1303_v22  ;;  %v1282_v34 = vld [vmem:[%s1882_s9 + $0xa0] ss:$8 sps:$4 sm:$0xff]   ;;  %v1283_v36 = vld [vmem:[%s1882_s9 + $0xb4] ss:$8 sps:$4 sm:$0xff]   ;;  %v1285_v38 = vld [vmem:[%s1882_s9 + $0xb0] ss:$8 sps:$4 sm:$0xff]  }
  0xa6   : > { %825 = vmatprep.subr.bf16.mxu1 %v1304_v23  ;;  %v1316_v39 = vld [vmem:[%s1895_s23 + $0x64] ss:$8 sps:$4 sm:$0xff]   ;;  %v1318_v41 = vld [vmem:[%s1895_s23 + $0x60] ss:$8 sps:$4 sm:$0xff]   ;;  %v1319_v43 = vld [vmem:[%s1895_s23 + $0x74] ss:$8 sps:$4 sm:$0xff]  }
  0xa7   : > { %573 = vmatpush1.bf16.msra.mxu0 %v1261_v8  ;;  %v1286_v40 = vld [vmem:[%s1882_s9 + $0xc4] ss:$8 sps:$4 sm:$0xff]   ;;  %v1288_v42 = vld [vmem:[%s1882_s9 + $0xc0] ss:$8 sps:$4 sm:$0xff]   ;;  %v1289_v44 = vld [vmem:[%s1882_s9 + $0xd4] ss:$8 sps:$4 sm:$0xff]  }
  0xa8   : > { %574 = vmatprep.subr.bf16.mxu0 %v1262_v9  ;;  %v1321_v45 = vld [vmem:[%s1895_s23 + $0x70] ss:$8 sps:$4 sm:$0xff]   ;;  %v1292_v47 = vld [vmem:[%s1882_s9 + $0xe4] ss:$8 sps:$4 sm:$0xff]   ;;  %v1294_v48 = vld [vmem:[%s1882_s9 + $0xe0] ss:$8 sps:$4 sm:$0xff]  }
  0xa9   : > { %826 = vmatpush1.bf16.msra.mxu1 %v1306_v26  ;;  %v1291_v46 = vld [vmem:[%s1882_s9 + $0xd0] ss:$8 sps:$4 sm:$0xff]   ;;  %v1295_v49 = vld [vmem:[%s1882_s9 + $0xf4] ss:$8 sps:$4 sm:$0xff]   ;;  %v1322_v53 = vld [vmem:[%s1895_s23 + $0x84] ss:$8 sps:$4 sm:$0xff]  }
  0xaa   : > { %827 = vmatprep.subr.bf16.mxu1 %v1307_v27  ;;  %v1297_v50 = vld [vmem:[%s1882_s9 + $0xf0] ss:$8 sps:$4 sm:$0xff]   ;;  %v1324_v54 = vld [vmem:[%s1895_s23 + $0x80] ss:$8 sps:$4 sm:$0xff]   ;;  %v1325_v55 = vld [vmem:[%s1895_s23 + $0x94] ss:$8 sps:$4 sm:$0xff]  }
  0xab   : > { %575 = vmatpush1.bf16.msra.mxu0 %v1264_v10  ;;  %v1327_v56 = vld [vmem:[%s1895_s23 + $0x90] ss:$8 sps:$4 sm:$0xff]   ;;  %v1328_v57 = vld [vmem:[%s1895_s23 + $0xa4] ss:$8 sps:$4 sm:$0xff]   ;;  %v1330_v58 = vld [vmem:[%s1895_s23 + $0xa0] ss:$8 sps:$4 sm:$0xff]  }
  0xac   : > { %576 = vmatprep.subr.bf16.mxu0 %v1265_v11  ;;  %v1331_v59 = vld [vmem:[%s1895_s23 + $0xb4] ss:$8 sps:$4 sm:$0xff]   ;;  %v1333_v60 = vld [vmem:[%s1895_s23 + $0xb0] ss:$8 sps:$4 sm:$0xff]   ;;  %v1334_v61 = vld [vmem:[%s1895_s23 + $0xc4] ss:$8 sps:$4 sm:$0xff]  }
  0xad   : > { %828 = vmatpush1.bf16.msra.mxu1 %v1309_v29  ;;  %v1336_v62 = vld [vmem:[%s1895_s23 + $0xc0] ss:$8 sps:$4 sm:$0xff]   ;;  %v1337_v63 = vld [vmem:[%s1895_s23 + $0xd4] ss:$8 sps:$4 sm:$0xff]   ;;  %v1339_v0 = vld [vmem:[%s1895_s23 + $0xd0] ss:$8 sps:$4 sm:$0xff]  }
  0xae   : > { %829 = vmatprep.subr.bf16.mxu1 %v1310_v31  ;;  %v1340_v1 = vld [vmem:[%s1895_s23 + $0xe4] ss:$8 sps:$4 sm:$0xff]   ;;  %v1342_v2 = vld [vmem:[%s1895_s23 + $0xe0] ss:$8 sps:$4 sm:$0xff]   ;;  %v1343_v3 = vld [vmem:[%s1895_s23 + $0xf4] ss:$8 sps:$4 sm:$0xff]  }
  0xaf   : > { %577 = vmatpush1.bf16.msra.mxu0 %v1267_v12  ;;  %v1345_v4 = vld [vmem:[%s1895_s23 + $0xf0] ss:$8 sps:$4 sm:$0xff]   ;;  %v397_v6 = vshrl.u32 %v396_v5, 7  ;;  %s2098_s8 = sld [smem:[#allocation22_spill]] (!%p1123_p0) }
  0xb0   : > { %578 = vmatprep.subr.bf16.mxu0 %v1268_v13  ;;  %v394_v8 = vld [vmem:[%s349_s30] sm:$0x3] }
  0xb1   : > { %830 = vmatpush1.bf16.msra.mxu1 %v1312_v33  ;;  %v398_v7 = vsub.s32 0, %v397_v6  ;;  %v402_v9 = vsub.s32 1, %v397_v6 }
  0xb2   : > { %831 = vmatprep.subr.bf16.mxu1 %v1313_v35 }
  0xb3   : > { %579 = vmatpush1.bf16.msra.mxu0 %v1270_v14  ;;  %v399_v10 = vrot.slane %v394_v8, %v398_v7  ;;  %v403_v11 = vrot.slane %v394_v8, %v402_v9 }
  0xb4   : > { %580 = vmatprep.subr.bf16.mxu0 %v1271_v19 }
  0xb5   : > { %832 = vmatpush1.bf16.msra.mxu1 %v1315_v37 }
  0xb6   : > { %833 = vmatprep.subr.bf16.mxu1 %v1316_v39  ;;  %v625_v39 = vld [vmem:[#allocation2] sm:$0xff] }
  0xb7   : > { %581 = vmatpush1.bf16.msra.mxu0 %v1273_v21 }
  0xb8   : > { %582 = vmatprep.subr.bf16.mxu0 %v1274_v24 }
  0xb9   : > { %834 = vmatpush1.bf16.msra.mxu1 %v1318_v41 }
  0xba   : > { %835 = vmatprep.subr.bf16.mxu1 %v1319_v43 }
  0xbb   : > { %583 = vmatpush1.bf16.msra.mxu0 %v1276_v25 }
  0xbc   : > { %584 = vmatprep.subr.bf16.mxu0 %v1277_v28 }
  0xbd   : > { %836 = vmatpush1.bf16.msra.mxu1 %v1321_v45 }
  0xbe   : > { %837 = vmatprep.subr.bf16.mxu1 %v1322_v53 }
  0xbf   : > { %585 = vmatpush1.bf16.msra.mxu0 %v1279_v30 }
  0xc0   : > { %586 = vmatprep.subr.bf16.mxu0 %v1280_v32 }
  0xc1   : > { %838 = vmatpush1.bf16.msra.mxu1 %v1324_v54 }
  0xc2   : > { %839 = vmatprep.subr.bf16.mxu1 %v1325_v55 }
  0xc3   : > { %587 = vmatpush1.bf16.msra.mxu0 %v1282_v34 }
  0xc4   : > { %588 = vmatprep.subr.bf16.mxu0 %v1283_v36 }
  0xc5   : > { %840 = vmatpush1.bf16.msra.mxu1 %v1327_v56 }
  0xc6   : > { %841 = vmatprep.subr.bf16.mxu1 %v1328_v57 }
  0xc7   : > { %589 = vmatpush1.bf16.msra.mxu0 %v1285_v38 }
  0xc8   : > { %590 = vmatprep.subr.bf16.mxu0 %v1286_v40  ;;  %v626_v40 = vld [vmem:[#allocation2 + $0x8] sm:$0xff] }
  0xc9   : > { %842 = vmatpush1.bf16.msra.mxu1 %v1330_v58 }
  0xca   : > { %843 = vmatprep.subr.bf16.mxu1 %v1331_v59 }
  0xcb   : > { %591 = vmatpush1.bf16.msra.mxu0 %v1288_v42 }
  0xcc   : > { %592 = vmatprep.subr.bf16.mxu0 %v1289_v44 }
  0xcd   : > { %844 = vmatpush1.bf16.msra.mxu1 %v1333_v60 }
  0xce   : > { %845 = vmatprep.subr.bf16.mxu1 %v1334_v61 }
  0xcf   : > { %593 = vmatpush1.bf16.msra.mxu0 %v1291_v46 }
  0xd0   : > { %594 = vmatprep.subr.bf16.mxu0 %v1292_v47 }
  0xd1   : > { %846 = vmatpush1.bf16.msra.mxu1 %v1336_v62 }
  0xd2   : > { %847 = vmatprep.subr.bf16.mxu1 %v1337_v63 }
  0xd3   : > { %595 = vmatpush1.bf16.msra.mxu0 %v1294_v48  ;;  %v872_v48 = vld [vmem:[%s2098_s8] sm:$0x3] (!%p1123_p0) }
  0xd4   : > { %596 = vmatprep.subr.bf16.mxu0 %v1295_v49 }
  0xd5   : > { %848 = vmatpush1.bf16.msra.mxu1 %v1339_v0 }
  0xd6   : > { %849 = vmatprep.subr.bf16.mxu1 %v1340_v1 }
  0xd7   : > { %597 = vmatpush1.bf16.msra.mxu0 %v1297_v50  ;;  %v877_v50 = vrot.slane (!%p1123_p0), %v872_v48, %v398_v7 }
  0xd9   : > { %850 = vmatpush1.bf16.msra.mxu1 %v1342_v2 }
  0xda   : > { %599 = vmatmul.mubr.bf16.vlgmr.msra.gmra.mrb[0].mxu0 %v360_v52  ;;  %851 = vmatprep.subr.bf16.mxu1 %v1343_v3  ;;  %v881_v52 = vrot.slane (!%p1123_p0), %v872_v48, %v402_v9 }
  0xdd   : > { %852 = vmatpush1.bf16.msra.mxu1 %v1345_v4 }
 0x1ad   : > { %v600_v12 = vpop.f32.mrb[0].mxu0 }
 0x1ae   : > { %v601_v13 = vadd.f32 %v600_v12, %v399_v10  ;;  %v602_v14 = vpop.f32.mrb[1].mxu0 }
 0x1af   : > { %v603_v16 = vadd.f32 %v602_v14, %v403_v11  ;;  %v604_v17 = vpop.f32.mrb[2].mxu0 }
 0x1b0   : > { %v607_v18 = vmul.f32 %v601_v13, %v601_v13  ;;  %v605_v19 = vpop.f32.mrb[3].mxu0 }
 0x1b1   : > { %v608_v20 = vmul.f32 %v603_v16, %v603_v16 }
 0x1b2   : > { %v609_v21 = vmul.f32 %v607_v18, %v601_v13 }
 0x1b3   : > { %v610_v22 = vmul.f32 %v608_v20, %v603_v16 }
 0x1b4   : > { %v611_v23 = vmul.f32 0.044715, %v609_v21 }
 0x1b5   : > { %v612_v24 = vmul.f32 0.044715, %v610_v22 }
 0x1b6   : > { %v613_v25 = vadd.f32 %v611_v23, %v601_v13 }
 0x1b7   : > { %v614_v26 = vadd.f32 %v612_v24, %v603_v16 }
 0x1b8   : > { %v615_v27 = vmul.f32 0.7978846, %v613_v25 }
 0x1b9   : > { %v616_v28 = vmul.f32 0.7978846, %v614_v26 }
 0x1ba   : > { %1346 = vtanh.f32 %v615_v27 }
 0x1bb   : > { %1348 = vtanh.f32 %v616_v28 }
 0x1c4   : > { %v1347_v29 = vpop.eup %1346 }
 0x1c5   : > { %v1349_v30 = vpop.eup %1348  ;;  %v619_v31 = vadd.f32 1.0, %v1347_v29 }
 0x1c6   : > { %v620_v32 = vadd.f32 1.0, %v1349_v30 }
 0x1c7   : > { %v621_v33 = vmul.f32 0.5, %v619_v31 }
 0x1c8   : > { %v622_v34 = vmul.f32 0.5, %v620_v32 }
 0x1c9   : > { %v623_v35 = vmul.f32 %v621_v33, %v601_v13 }
 0x1ca   : > { %v624_v36 = vmul.f32 %v622_v34, %v603_v16 }
 0x1cb   : > { %v627_v38 = vpack.c.bf16 %v623_v35, %v623_v35 }
 0x1cc   : > { %v628_v37 = vpack.c.bf16 %v624_v36, %v624_v36 }
 0x1ce   : > { %853 = vmatprep.mubr.bf16.mxu1 %v628_v37 }
 0x1cf   : > { %854 = vmatmul.mubr.bf16.vlgmr.msra.gmra.mrb[0].mxu1 %v627_v38 }
 0x2a0   : > { %869 = sbr.rel (%p1123_p0) target bundleno = 691 (0x2b3), region = 60 }
 0x2a2   : > { %v855_v41 = vpop.f32.mrb[0].mxu1 }
 0x2a3   : > { %v862_v42 = vadd.f32 %v855_v41, %v625_v39  ;;  %v857_v43 = vpop.f32.mrb[1].mxu1 }
 0x2a4   : > { %v863_v44 = vadd.f32 %v857_v43, %v626_v40  ;;  %v859_v45 = vpop.f32.mrb[2].mxu1 }
 0x2a5   : > { %864 = vst [vmem:[#allocation2] sm:$0xff] %v862_v42  ;;  %v860_v46 = vpop.f32.mrb[3].mxu1 }
 0x2a6   : > { %865 = vst [vmem:[#allocation2 + $0x8] sm:$0xff] %v863_v44 }
 0x2ac   : > { %v870_v47 = vld [vmem:[#allocation2] sm:$0xff] }
 0x2ad   : > { %v871_v49 = vld [vmem:[#allocation2 + $0x8] sm:$0xff]  ;;  %v884_v53 = vadd.f32 %v877_v50, %v870_v47 }
 0x2ae   : > { %v885_v54 = vadd.f32 %v881_v52, %v871_v49 }
 0x2af   : > { %v886_v55 = vadd.f32 %v884_v53, %v1954_v51 }
 0x2b0   : > { %v887_v56 = vadd.f32 %v885_v54, %v1915_v15 }
 0x2b1   : > { %888 = vst [vmem:[%s1897_s18] sm:$0xff] %v886_v55 }
 0x2b2   : > { %889 = vst [vmem:[%s1897_s18 + $0x8] sm:$0xff] %v887_v56 }
 0x2b3 PF: > { %s2099_s24 = sld [smem:[#allocation14_spill]]  ;;  %s2100_s10 = sld [smem:[#allocation23_spill]] }
 0x2b4   : > { %s905_s9 = sshll.u32 %s1897_s18, 4  ;;  %s891_s1 = scalar_lea.sflag [#allocation5], %s1870_s13  ;;  %s906_s9 = int_to_ptr.vmem [resolvable:$true] %s905_s9 }
 0x2b5   : > { %s1440_s7 = scalar_lea.vmem %s906_s9, 256  ;;  %p2101_p13 = scmp.ne.s32.totalorder %s2085_s5, 0 }
 0x2b6   : > { %p1441_p3 = scmp.ne.s32.totalorder %s906_s9, %s1440_s7  ;;  %s1575_s25 = smov [#allocation9]  }
 0x2b7   : > { %s1444_s11 = sshll.u32 %s1575_s25, 4  ;;  %s1445_s11 = int_to_ptr.vmem [resolvable:$false] %s1444_s11 }
 0x2b8   : > { %p1442_p9 = pnand %p1441_p3, %p2101_p13  ;;  %s1446_s30 = scalar_lea.vmem %s1445_s11, 512 }
 0x2b9   : > { %s1133_s17 = sshll.u32 %s2099_s24, 8  ;;  %p1447_p11 = scmp.lt.s32.totalorder %s906_s9, %s1445_s11 }
 0x2ba   : > { %s1991_s4 = scalar_lea.hbm %s2100_s10, %s1133_s17  ;;  %p1443_p12 = pneg %p1442_p9 }
 0x2bb   : > { %p1448_p2 = scmp.lt.s32.totalorder %s1446_s30, %s1440_s7 }
 0x2bd   : > { %p1449_p1 = por %p1448_p2, %p1447_p11 }
 0x2bf   : > { %p1450_p5 = pnand %p1449_p1, %p1443_p12 }
 0x2c1   : > { %1453 = shalt.err (!%p1450_p5)
}
 0x2c2   : > { %s1454_s13 = scalar_lea.hbm %s1991_s4, 256  ;;  %s1458_s29 = scalar_lea.hbm %s2100_s10, 512 }
 0x2c3   : > { %p1455_p7 = scmp.ne.s32.totalorder %s1991_s4, %s1454_s13  ;;  %p1459_p10 = scmp.lt.u32.totalorder %s1991_s4, %s2100_s10 }
 0x2c4   : > { %p1460_p6 = scmp.lt.u32.totalorder %s1458_s29, %s1454_s13  ;;  %p1462_p3 = scmp.lt.u32.totalorder %s1454_s13, %s1991_s4 }
 0x2c5   : > { %p1456_p8 = pnand %p1455_p7, %p2101_p13 }
 0x2c6   : > { %p1461_p0 = por %p1460_p6, %p1459_p10 }
 0x2c7   : > { %p1457_p4 = pneg %p1456_p8 }
 0x2c8   : > { %p1463_p9 = por %p1462_p3, %p1461_p0 }
 0x2ca   : > { %p1464_p12 = pnand %p1463_p9, %p1457_p4 }
 0x2cc   : > { %1467 = shalt.err (!%p1464_p12)
}
 0x2cd   : > { %1140 = dma.vmem_to_hbm [thread:$0]  (%p2101_p13), %s906_s9, 256, %s1991_s4, %s891_s1  }
 0x2ce PF: > { %p1157_p11 = scmp.ge.s32.totalorder %s1566_s28, 2  ;;  %s917_s16 = sand.u32 1, %s1538_s21  }
 0x2cf   : > { %p2102_p2 = scmp.ne.s32.totalorder %s2086_s6, 0  ;;  %s918_s27 = scalar_lea.sflag [#allocation5], %s917_s16 }
 0x2d1   : > { %p1153_p1 = pnand %p1157_p11, %p2102_p2 }
 0x2d3   : > { %1521 = dma.done.wait (!%p1153_p1), %s918_s27, 256  }
 0x2d4   : > { %1523 = vsyncadd (!%p1153_p1), %s918_s27, 4294967040  ;;  %s24_s28 = sadd.s32 1, %s1566_s28   ;;  %s2103_s8 = sld [smem:[#allocation18_spill]] }
 0x2d5   : > { %p21_p5 = scmp.ge.s32.totalorder %s24_s28, 6   ;;  %s2104_s5 = sld [smem:[#allocation13_spill]] }
 0x2d6   : > { %s2105_s23 = sld [smem:[#allocation19_spill]]  ;;  %s2106_s25 = sld [smem:[#allocation15_spill]] }
 0x2d7   : > { %s2107_s17 = sld [smem:[#allocation16_spill]]  ;;  %s2108_s27 = sld [smem:[#allocation17_spill]] }
 0x2d8   : > { %s2109_s18 = smov %s1530_s19  ;;  %s2110_s19 = smov %s1534_s20 }
 0x2d9   : > { %s2112_s21 = smov %s1542_s22  ;;  %s2114_s24 = smov %s1558_s26 }
 0x2da   : > { %s2111_s20 = smov %s2103_s8  ;;  %23 = sbr.rel (!%p21_p5) target bundleno = 16 (0x10), region = 120 }
 0x2db   : > { %s2113_s22 = smov %s2104_s5 }
 0x2dd   : > { %s2115_s26 = smov %s2107_s17 }
 0x2e1   :  { %923 = vsyncpa [#allocation4], 1 }
 0x2e2   :  { %925 = vsyncpa [#allocation4 + $0x1], 1 }
 0x2e3   :  { %926 = vsyncpa [#allocation7], 1 }
 0x2e4   :  { %928 = vsyncpa [#allocation7 + $0x1], 1 }
 0x2e5   :  { %929 = vsyncpa [#allocation5], 1 }
 0x2e6   :  { %931 = vsyncpa [#allocation5 + $0x1], 1 }

</bundles_post_ra>
